<compile_context>
chip_gen: v6e
topology: v6e:2x2x1
jax: 0.10.0
libtpu: 0.0.40
codegen_flags: <defaults>
</compile_context>

<pallas_src>
import functools
import math

import jax
import jax.numpy as jnp
from jax.experimental import pallas as pl
from jax.experimental.pallas import tpu as pltpu


# ---------------------------------------------------------------------------
# Kernel
# ---------------------------------------------------------------------------
def _pe_kernel(cols_ref, rows_ref, o_ref):
    """One tile of positions: out[p, j] = sin((p0 + p) * div[j] + phase[j]).

    cols_ref: (2, size) f32 — row 0: div[2i] = div[2i+1] = exp(-2i*ln(freq)/size),
                              row 1: phase   = [0, pi/2, 0, pi/2, ...]
    rows_ref: (tile_s, 1) f32 — row indices 0..tile_s-1 (constant, VMEM resident)
    o_ref:    (tile_s, size) f32 output block.

    Even columns give sin(pos*div), odd columns give cos(pos*div) via the pi/2 phase.
    Per element: one mul + one add (VPU) + one sin; everything position-offset /
    column-only is hoisted to a single per-tile (1, size) vector op.
    """
    tile_s = rows_ref.shape[0]
    div = cols_ref[0:1, :]                                   # (1, size)
    phase = cols_ref[1:2, :]                                 # (1, size)
    # Per-tile column offset: (grid_offset * div + phase), ONE (1,size) mul+add / step.
    base = (pl.program_id(0) * tile_s).astype(jnp.float32)   # scalar
    col_off = base * div + phase                             # (1, size)
    # Per element: rows (tile_s,1) broadcasts over lanes, div/col_off over sublanes.
    o_ref[...] = jnp.sin(rows_ref[...] * div + col_off)


# ---------------------------------------------------------------------------
# Tiling helpers
# ---------------------------------------------------------------------------
_ROW_TILE_CAP = 2048                  # max rows per output block (sublane dim)
_OUT_VMEM_BUDGET = 16 * 1024 * 1024   # double-buffered output budget (v7x headroom)
_VMEM_LIMIT_BYTES = 32 * 1024 * 1024  # explicit scoped-VMEM limit (<= every chip)


def _round_up(x: int, m: int) -> int:
    return ((x + m - 1) // m) * m


def _tensorcores_per_chip() -> int:
    """Best-effort TC count per chip; v7x has 2, v5e/v6e have 1.  Fallback: 1."""
    try:
        kind = jax.devices()[0].device_kind.lower()
    except Exception:
        return 1
    return 2 if "v7" in kind else 1


def _choose_tile(seq_len: int, size: int, num_cores: int) -> int:
    """Pick the position-tile height (sublane dim of the output block)."""
    if seq_len <= 8:
        return seq_len
    padded = _round_up(seq_len, 8)
    # Output is double-buffered: keep 2 * tile_s * size * 4 B under the budget so
    # the kernel fits v7x's 32 MiB scoped default (64 MiB physical) with headroom;
    # v5e/v6e have 128 MiB physical so this is conservative there.
    max_rows = max(8, (_OUT_VMEM_BUDGET // (2 * size * 4)) // 8 * 8)
    tile = min(_ROW_TILE_CAP, max_rows, padded)
    if num_cores > 1 and seq_len > 8 * num_cores:
        # 2-TC chips (v7x): use a balanced, core-count-multiple number of blocks so
        # both TensorCores get equal work under dimension_semantics=("parallel",).
        n_steps = _round_up(max(pl.cdiv(padded, tile), num_cores), num_cores)
        tile = min(tile, _round_up(pl.cdiv(seq_len, n_steps), 8))
    return max(tile, 8)


# ---------------------------------------------------------------------------
# Table builder (cached — the PyTorch module precomputes this once in __init__)
# ---------------------------------------------------------------------------
@functools.lru_cache(maxsize=None)
def _build_pe_table(seq_len: int, size: int, max_len: int, frequency: float) -> jax.Array:
    """Build (1, seq_len, size) float32 PE table with a Pallas kernel (cached)."""
    if size % 2 != 0:
        raise ValueError(
            f"Cannot use sin/cos positional encoding with odd dim (got dim={size})")
    if seq_len > max_len:
        raise ValueError(f"seq_len {seq_len} exceeds max_len {max_len}")

    half = size // 2
    # Column-only precompute, hoisted out of the kernel (no per-element exp):
    div_half = jnp.exp(jnp.arange(0, size, 2, dtype=jnp.float32)
                       * (-(math.log(frequency) / size)))            # (half,)
    div_full = jnp.repeat(div_half, 2)                                # (size,)
    phase = jnp.tile(jnp.array([0.0, math.pi / 2.0], dtype=jnp.float32), half)
    cols = jnp.stack([div_full, phase], axis=0)                       # (2, size)

    num_cores = _tensorcores_per_chip()
    tile_s = _choose_tile(seq_len, size, num_cores)
    rows = jnp.arange(tile_s, dtype=jnp.float32)[:, None]             # (tile_s, 1)

    grid = (pl.cdiv(seq_len, tile_s),)

    cost = pl.CostEstimate(
        flops=2 * seq_len * size,
        transcendentals=seq_len * size,
        bytes_accessed=seq_len * size * 4,
    )

    return pl.pallas_call(
        _pe_kernel,
        out_shape=jax.ShapeDtypeStruct((1, seq_len, size), jnp.float32),
        grid_spec=pltpu.PrefetchScalarGridSpec(
            num_scalar_prefetch=0,
            grid=grid,
            in_specs=[
                # Constant-index, loop-invariant inputs (stay VMEM resident).
                pl.BlockSpec((2, size), lambda i: (0, 0)),      # div + phase
                pl.BlockSpec((tile_s, 1), lambda i: (0, 0)),    # f32 row indices
            ],
            # Leading batch dim squeezed; kernel sees (tile_s, size).
            out_specs=pl.BlockSpec((None, tile_s, size), lambda i: (0, i, 0)),
        ),
        compiler_params=pltpu.CompilerParams(
            dimension_semantics=("parallel",),
            vmem_limit_bytes=_VMEM_LIMIT_BYTES),
        cost_estimate=cost,
    )(cols, rows)


# ---------------------------------------------------------------------------
# Public forward
# ---------------------------------------------------------------------------
def positional_encoding(emb: jax.Array,
                        size: int,
                        max_len: int = 5000,
                        frequency: float = 10000.0) -> jax.Array:
    """Pallas equivalent of PositionalEncoding.forward(emb).

    emb: (batch, seq_len, dim) — only the static seq_len is used.
    returns: (1, seq_len, size) float32 positional encodings.
    """
    seq_len = int(emb.shape[1])
    return _build_pe_table(seq_len, int(size), int(max_len), float(frequency))


# ---------------------------------------------------------------------------
# Pure-JAX reference (mirrors the PyTorch __init__ buffer construction)
# ---------------------------------------------------------------------------
def _reference_pe(seq_len: int, size: int, frequency: float = 10000.0) -> jax.Array:
    position = jnp.arange(seq_len, dtype=jnp.float32)[:, None]
    div_term = jnp.exp(jnp.arange(0, size, 2, dtype=jnp.float32)
                       * -(math.log(frequency) / size))
    pe = jnp.zeros((seq_len, size), jnp.float32)
    pe = pe.at[:, 0::2].set(jnp.sin(position * div_term))
    pe = pe.at[:, 1::2].set(jnp.cos(position * div_term))
    return pe[None]


if __name__ == "__main__":
    key = jax.random.PRNGKey(0)

    # Small case consistent with the module's forward signature.
    batch, seq_len, dim = 2, 8, 32
    emb = jax.random.normal(key, (batch, seq_len, dim), dtype=jnp.float32)
    out = jax.block_until_ready(positional_encoding(emb, size=dim))
    ref = _reference_pe(seq_len, dim)
    assert out.shape == (1, seq_len, dim), out.shape
    assert jnp.allclose(out, ref, atol=1e-5), float(jnp.max(jnp.abs(out - ref)))

    # Lane-dense case (exercises single-block path on v5e/v6e, balanced 2-block on v7x).
    seq_len2, dim2 = 128, 128
    emb2 = jax.random.normal(key, (1, seq_len2, dim2), dtype=jnp.float32)
    out2 = jax.block_until_ready(positional_encoding(emb2, size=dim2))
    ref2 = _reference_pe(seq_len2, dim2)
    assert out2.shape == (1, seq_len2, dim2), out2.shape
    assert jnp.allclose(out2, ref2, atol=1e-4), float(jnp.max(jnp.abs(out2 - ref2)))

    # Longer sequence / smaller dim (exercises the balanced-split bookkeeping).
    seq_len3, dim3 = 200, 64
    emb3 = jax.random.normal(key, (1, seq_len3, dim3), dtype=jnp.float32)
    out3 = jax.block_until_ready(positional_encoding(emb3, size=dim3))
    ref3 = _reference_pe(seq_len3, dim3)
    assert out3.shape == (1, seq_len3, dim3), out3.shape
    assert jnp.allclose(out3, ref3, atol=1e-4), float(jnp.max(jnp.abs(out3 - ref3)))

    print("KERNEL_OK")
</pallas_src>

<mosaic_0001>
module attributes {stable_mosaic.version = 11 : i64} {
  func.func @_pe_kernel(%arg0: i32, %arg1: memref<2x32xf32, #tpu.memory_space<vmem>>, %arg2: memref<8x1xf32, #tpu.memory_space<vmem>>, %arg3: memref<1x8x32xf32, #tpu.memory_space<vmem>>) attributes {dimension_semantics = [#tpu.dimension_semantics<parallel>], iteration_bounds = array<i64: 1>, scalar_prefetch = 0 : i64, scratch_operands = 0 : i64, tpu.core_type = #tpu.core_type<tc>, window_params = [{pipeline_mode = #tpu.pipeline_mode<synchronous>, transform_indices = @transform_0, window_bounds = array<i64: 2, 32>}, {pipeline_mode = #tpu.pipeline_mode<synchronous>, transform_indices = @transform_1, window_bounds = array<i64: 8, 1>}, {transform_indices = @transform_2, window_bounds = array<i64: 1, 8, 32>}]} {
    %c0 = arith.constant 0 : index
    %c0_0 = arith.constant 0 : index
    %0 = vector.load %arg1[%c0, %c0_0] : memref<2x32xf32, #tpu.memory_space<vmem>>, vector<1x32xf32>
    %c1 = arith.constant 1 : index
    %c0_1 = arith.constant 0 : index
    %1 = vector.load %arg1[%c1, %c0_1] : memref<2x32xf32, #tpu.memory_space<vmem>>, vector<1x32xf32>
    %c8_i32 = arith.constant 8 : i32
    %2 = arith.muli %arg0, %c8_i32 : i32
    %3 = arith.sitofp %2 : i32 to f32
    %4 = vector.broadcast %3 : f32 to vector<1x32xf32>
    %5 = arith.mulf %4, %0 : vector<1x32xf32>
    %6 = arith.addf %5, %1 : vector<1x32xf32>
    %c0_2 = arith.constant 0 : index
    %c0_3 = arith.constant 0 : index
    %7 = vector.load %arg2[%c0_2, %c0_3] : memref<8x1xf32, #tpu.memory_space<vmem>>, vector<8x1xf32>
    %8 = vector.broadcast %7 : vector<8x1xf32> to vector<8x32xf32>
    %9 = vector.broadcast %0 : vector<1x32xf32> to vector<8x32xf32>
    %10 = arith.mulf %8, %9 : vector<8x32xf32>
    %11 = vector.broadcast %6 : vector<1x32xf32> to vector<8x32xf32>
    %12 = arith.addf %10, %11 : vector<8x32xf32>
    %13 = math.sin %12 : vector<8x32xf32>
    %c0_4 = arith.constant 0 : index
    %c0_5 = arith.constant 0 : index
    %c0_6 = arith.constant 0 : index
    %14 = vector.load %arg3[%c0_4, %c0_5, %c0_6] : memref<1x8x32xf32, #tpu.memory_space<vmem>>, vector<1x8x32xf32>
    %15 = vector.shape_cast %14 : vector<1x8x32xf32> to vector<8x32xf32>
    %16 = vector.shape_cast %13 : vector<8x32xf32> to vector<1x8x32xf32>
    tpu.vector_store %arg3[%c0_4, %c0_5, %c0_6], %16 {strides = array<i32>} : memref<1x8x32xf32, #tpu.memory_space<vmem>>, vector<1x8x32xf32>,
    return
  }
  func.func @transform_0(%arg0: i32) -> (i32, i32) {
    %c0_i32 = arith.constant 0 : i32
    %c0_i32_0 = arith.constant 0 : i32
    %c0_i32_1 = arith.constant 0 : i32
    return %c0_i32, %c0_i32_0 : i32, i32
  }
  func.func @transform_1(%arg0: i32) -> (i32, i32) {
    %c0_i32 = arith.constant 0 : i32
    %c0_i32_0 = arith.constant 0 : i32
    %c0_i32_1 = arith.constant 0 : i32
    return %c0_i32, %c0_i32_0 : i32, i32
  }
  func.func @transform_2(%arg0: i32) -> (i32, i32, i32) {
    %c0_i32 = arith.constant 0 : i32
    %c0_i32_0 = arith.constant 0 : i32
    %c0_i32_1 = arith.constant 0 : i32
    return %c0_i32, %arg0, %c0_i32_0 : i32, i32, i32
  }
}

</mosaic_0001>

<bundles_post_ra>
// kernel: tpu_custom_call.1
= control target key start
LH: loop header
LB: loop body
LE: loop exit
PB: predicated region body
PF: predicated region fallthrough
CT: control target
= control target key end

     0   :  { %v198_v1 = vmov 0   ;;  %s254_s0 = inlined_call_operand.vmem [shape: f32[2,32], index: 0, kind: input, shape index: {}]   ;;  %s255_s1 = inlined_call_operand.vmem [shape: f32[8,1], index: 1, kind: input, shape index: {}]   ;;  %s256_s2 = inlined_call_operand.hbm [shape: f32[1,8,32], index: 2, kind: output, shape index: {}]  }
   0x1   :  { %v19_v0 = vld [vmem:[%s255_s1] sm:$0xff]  ;;  %171 = vset.pattern.permute.xlu0 %v198_v1 }
   0x2   :  { %22 = vperm.xlu0 %171, %v19_v0  }
   0x3   :  { %7 = vsyncpa [#allocation3], 0  ;;  %v25_v2 = vlaneseq  ;;  %v12_v3 = vld [vmem:[%s254_s0] sm:$0x1]  ;;  %v13_v6 = vld [vmem:[%s254_s0 + $0x1] sm:$0x1] }
   0x4   :  { %v17_v5 = vmul.f32 0.0, %v12_v3  ;;  %v199_v25 = vmov 2102212464   ;;  %v200_v27 = vmov 920167782   ;;  %s205_s0 = smov [#allocation2]  }
   0x5   :  { %v26_v4 = vshrl.u32 %v25_v2, 7  ;;  %v201_v31 = vmov 1326507024   ;;  %v202_v33 = vmov 683565275   ;;  %s147_s1 = sshll.u32 %s205_s0, 4  ;;  %s148_s1 = int_to_ptr.vmem [resolvable:$true] %s147_s1 }
   0x6   :  { %v18_v8 = vadd.f32 %v17_v5, %v13_v6  ;;  %v203_v35 = vmov 2475754826   ;;  %v204_v38 = vmov 2131351028   ;;  %vm139_vm12 = vcmask 261120   ;;  %s176_s15 = scalar_lea.vmem %s148_s1, 128  ;;  %p181_p1 = scmp.lt.s32.totalorder %s148_s1, %s148_s1 }
   0x7   :  { %v27_v7 = vsub.s32 0, %v26_v4  ;;  %p177_p0 = scmp.ne.s32.totalorder %s148_s1, %s176_s15  ;;  %p182_p2 = scmp.lt.s32.totalorder %s176_s15, %s176_s15 }
   0x9   :  { %v28_v9 = vrot.slane %v12_v3, %v27_v7  ;;  %v33_v10 = vrot.slane %v18_v8, %v27_v7  ;;  %p183_p3 = por %p182_p2, %p181_p1 }
   0xb   :  { %p184_p4 = pnand %p183_p3, %p177_p0 }
  0x7d   :  { %v23_v11 = vpop.permute.xlu0 %22 }
  0x7e   :  { %v29_v12 = vmul.f32 %v28_v9, %v23_v11 }
  0x80   :  { %v230_v13 = vadd.f32 %v33_v10, %v29_v12 }
  0x82   :  { %v38_v14 = vand.u32 2139095040, %v230_v13  ;;  %v35_v15 = vand.u32 2147483647, %v230_v13  ;;  %vm37_vm7 = vcmp.lt.s32.totalorder %v230_v13, 0  ;;  %vm127_vm13 = vweird.f32 %v230_v13 }
  0x84   :  { %v39_v16 = vshrl.u32 %v38_v14, 23  ;;  %v42_v18 = vand.u32 8388607, %v35_v15  ;;  %vm36_vm8 = vcmp.le.f32.partialorder %v35_v15, 0.7853982 }
  0x86   :  { %v155_v17 = vadd.s32 4294967169, %v39_v16  ;;  %v43_v21 = vor.u32 8388608, %v42_v18 }
  0x88   :  { %v45_v19 = vadd.s32 1, %v155_v17  ;;  %v83_v29 = vshll.u32 %v43_v21, 8 }
  0x8a   :  { %vm46_vm0 = vcmp.gt.s32.totalorder %v45_v19, 0 }
  0x8b   :  { %v47_v20 = vsel %vm46_vm0, %v45_v19, 0 }
  0x8c   :  { %v49_v22 = vand.u32 31, %v47_v20  ;;  %v48_v23 = vshrl.u32 %v47_v20, 5 }
  0x8e   :  { %v50_v24 = vsub.s32 32, %v49_v22  ;;  %v61_v26 = vshll.u32 %v199_v25, %v49_v22  ;;  %v64_v28 = vshll.u32 %v200_v27, %v49_v22  ;;  %v52_v34 = vshll.u32 %v202_v33, %v49_v22 }
  0x8f   :  { %v55_v37 = vshll.u32 %v203_v35, %v49_v22  ;;  %v58_v40 = vshll.u32 %v204_v38, %v49_v22  ;;  %vm70_vm1 = vcmp.lt.s32.totalorder %v48_v23, 4  ;;  %vm67_vm2 = vcmp.lt.s32.totalorder %v48_v23, 1 }
  0x90   :  { %v62_v30 = vshrl.u32 %v200_v27, %v50_v24  ;;  %v65_v32 = vshrl.u32 %v201_v31, %v50_v24  ;;  %v53_v36 = vshrl.u32 %v203_v35, %v50_v24  ;;  %v56_v39 = vshrl.u32 %v204_v38, %v50_v24 }
  0x91   :  { %v59_v41 = vshrl.u32 %v199_v25, %v50_v24  ;;  %v51_v45 = vshrl.u32 %v202_v33, %v50_v24  ;;  %vm68_vm3 = vcmp.lt.s32.totalorder %v48_v23, 2  ;;  %vm69_vm4 = vcmp.lt.s32.totalorder %v48_v23, 3 }
  0x92   :  { %v63_v42 = vor.u32 %v62_v30, %v61_v26  ;;  %v66_v43 = vor.u32 %v65_v32, %v64_v28  ;;  %v54_v44 = vor.u32 %v53_v36, %v52_v34  ;;  %v57_v46 = vor.u32 %v56_v39, %v55_v37 }
  0x93   :  { %v60_v47 = vor.u32 %v59_v41, %v58_v40 }
  0x94   :  { %v76_v48 = vsel %vm70_vm1, %v63_v42, 920167782  ;;  %v80_v49 = vsel %vm70_vm1, %v66_v43, 1326507024  ;;  %v75_v51 = vsel %vm67_vm2, %v54_v44, %v57_v46  ;;  %v71_v54 = vsel %vm67_vm2, %v51_v45, %v54_v44 }
  0x95   :  { %v72_v50 = vsel %vm70_vm1, %v60_v47, 2102212464  ;;  %v77_v52 = vsel %vm69_vm4, %v60_v47, %v76_v48  ;;  %v79_v53 = vsel %vm67_vm2, %v57_v46, %v60_v47  ;;  %v81_v57 = vsel %vm69_vm4, %v63_v42, %v80_v49 }
  0x96   :  { %v73_v55 = vsel %vm69_vm4, %v57_v46, %v72_v50  ;;  %v78_v56 = vsel %vm68_vm3, %v75_v51, %v77_v52  ;;  %v82_v58 = vsel %vm68_vm3, %v79_v53, %v81_v57 }
  0x97   :  { %v236_v59 = vmul.u32.u64.low %v83_v29, %v78_v56  ;;  %v237_v60 = vmul.u32.u64.high %v83_v29, %v78_v56, %v236_v59  ;;  %v239_v61 = vmul.u32.u64.low %v83_v29, %v82_v58  ;;  %v240_v62 = vmul.u32.u64.high %v83_v29, %v82_v58, %v239_v61 }
  0x98   :  { %v74_v63 = vsel %vm68_vm3, %v71_v54, %v73_v55 }
  0x99   :  { %v93_v0 = vadd.s32 1, %v237_v60  ;;  %v90_v1 = vmul.u32 %v83_v29, %v74_v63  ;;  %vm92_vm5 = vc.u32 %v240_v62, %v236_v59  ;;  %v91_v14 = vadd.s32 %v236_v59, %v240_v62 }
  0x9b   :  { %v94_v2 = vsel %vm92_vm5, %v93_v0, %v237_v60 }
  0x9c   :  { %v95_v3 = vadd.s32 %v94_v2, %v90_v1 }
  0x9e   :  { %v96_v4 = vadd.s32 536870912, %v95_v3 }
  0xa0   :  { %v97_v5 = vshrl.u32 %v96_v4, 30 }
  0xa2   :  { %v98_v6 = vshll.u32 %v97_v5, 30  ;;  %v121_v28 = vsub.s32 4, %v97_v5 }
  0xa4   :  { %v99_v7 = vsub.s32 %v95_v3, %v98_v6  ;;  %v122_v31 = vsel %vm37_vm7, %v121_v28, %v97_v5 }
  0xa5   :  { %v124_v32 = vsel %vm36_vm8, 0, %v122_v31 }
  0xa6   :  { %v101_v8 = vsub.s32 0, %v99_v7  ;;  %v128_v33 = vadd.s32 3, %v124_v32 }
  0xa8   :  { %v156_v9 = vmin.u32 %v101_v8, %v99_v7  ;;  %v129_v34 = vand.u32 3, %v128_v33 }
  0xaa   :  { %v103_v10 = vclz %v156_v9  ;;  %vm134_vm9 = vcmp.eq.s32.totalorder %v129_v34, 2  ;;  %vm131_vm10 = vcmp.eq.s32.totalorder %v129_v34, 0  ;;  %vm130_vm11 = vcmp.lt.s32.totalorder %v129_v34, 2 }
  0xac   :  { %v157_v11 = vadd.s32 4294967294, %v103_v10 }
  0xae   :  { %vm158_vm6 = vcmp.lt.s32.totalorder %v157_v11, 0 }
  0xaf   :  { %v106_v12 = vsel %vm158_vm6, 0, %v157_v11 }
  0xb0   :  { %v107_v16 = vsub.s32 32, %v106_v12  ;;  %v111_v17 = vsub.s32 4294967266, %v106_v12  ;;  %v108_v18 = vshll.u32 %v99_v7, %v106_v12 }
  0xb2   :  { %v109_v19 = vshrl.u32 %v91_v14, %v107_v16  ;;  %v112_v20 = vadd.s32 127, %v111_v17 }
  0xb4   :  { %v110_v21 = vor.u32 %v109_v19, %v108_v18  ;;  %v113_v22 = vshll.u32 %v112_v20, 23 }
  0xb6   :  { %v114_v23 = vor.u32 4788187, %v113_v22  ;;  %v117_v25 = vcvt.s32.f32 %v110_v21 }
  0xb8   :  { %v115_v24 = vand.u32 2147483647, %v114_v23 }
  0xba   :  { %v118_v26 = vmul.f32 %v117_v25, %v115_v24 }
  0xbc   :  { %v119_v27 = vxor.u32 2147483648, %v118_v26 }
  0xbe   :  { %v120_v29 = vsel %vm37_vm7, %v119_v27, %v118_v26 }
  0xbf   :  { %v123_v30 = vsel %vm36_vm8, %v230_v13, %v120_v29 }
  0xc0   :  { %172 = vcosq.f32 %v123_v30 }
  0xc1   :  { %174 = vsinq.f32 %v123_v30 }
  0xcd   :  { %v173_v35 = vpop.eup %172 }
  0xce   :  { %v175_v36 = vpop.eup %174  ;;  %v135_v37 = vxor.u32 2147483648, %v173_v35 }
  0xcf   :  { %v132_v38 = vxor.u32 2147483648, %v175_v36 }
  0xd0   :  { %v136_v39 = vsel %vm134_vm9, %v135_v37, %v175_v36 }
  0xd1   :  { %v133_v15 = vsel %vm131_vm10, %v173_v35, %v132_v38 }
  0xd2   :  { %v137_v40 = vsel %vm130_vm11, %v133_v15, %v136_v39 }
  0xd3   :  { %v138_v41 = vsel %vm127_vm13, nan, %v137_v40 }
  0xd4   :  { %140 = vst.msk [vmem:[#allocation2] sm:$0xff] %vm139_vm12, %v138_v41 }
  0xd5   :  { %187 = shalt.err (!%p184_p4)
}
  0xd6   :  { %150 = dma.vmem_to_hbm [thread:$0]  %s148_s1, 128, %s256_s2, [#allocation3]  }
  0xd7   :  { %196 = dma.done.wait [#allocation3], 128  }
  0xd8   :  { %197 = vsyncadd [#allocation3], 4294967168 }
  0xd9   :  { %154 = vsyncpa [#allocation3], 1 }

</bundles_post_ra>
